<compile_context>
chip_gen: v5e
topology: v5e:2x2
jax: 0.10.0
libtpu: 0.0.40
codegen_flags: <defaults>
</compile_context>

<pallas_src>
import jax
import jax.numpy as jnp
from jax.experimental import pallas as pl
from jax.experimental.pallas import tpu as pltpu

_SENTINEL = jnp.iinfo(jnp.int32).min  # never a valid (non-negative) label


def _supcon_kernel(logits_ref, labels_ref, negrow_ref, out_ref):
    # logits_ref : [T, N] caller dtype (bf16/f32) ; N = B + 1
    # labels_ref : [T, 1] int32
    # negrow_ref : [1, N] int32  (col 0 = sentinel, cols 1..B = neg_labels)
    # out_ref    : [T, 1] f32    per-row -log(v)
    x = logits_ref[...].astype(jnp.float32)                     # [T, N]
    labels = labels_ref[...]                                    # [T, 1]
    neg = negrow_ref[...]                                       # [1, N]

    ind = labels == neg                                         # [T, N] bool, col0 False

    # Numerically stable shifted exponentials; the shift cancels in the logs.
    m = jnp.max(x, axis=-1, keepdims=True)                      # [T, 1]
    e = jnp.exp(x - m)                                          # [T, N]
    se = jnp.sum(e, axis=-1, keepdims=True)                     # [T, 1]
    sm = jnp.sum(jnp.where(ind, e, 0.0), axis=-1, keepdims=True) + e[:, :1]
    den = jnp.sum(ind.astype(jnp.float32), axis=-1, keepdims=True) + 1.0

    # -log( (sum p*mask)/den ) = log(sum e) - log(sum e*mask) + log(den)
    out_ref[...] = jnp.log(se) - jnp.log(sm) + jnp.log(den)


def _supcon_kernel_den(logits_ref, labels_ref, negrow_ref, den_ref, out_ref):
    # Same as above but den (= 1 + #positives per row) is precomputed outside.
    x = logits_ref[...].astype(jnp.float32)
    labels = labels_ref[...]
    neg = negrow_ref[...]

    ind = labels == neg
    m = jnp.max(x, axis=-1, keepdims=True)
    e = jnp.exp(x - m)
    se = jnp.sum(e, axis=-1, keepdims=True)
    sm = jnp.sum(jnp.where(ind, e, 0.0), axis=-1, keepdims=True) + e[:, :1]

    out_ref[...] = jnp.log(se) - jnp.log(sm) + jnp.log(den_ref[...])


def _detect_platform():
    """Generation-aware (vmem_budget, vmem_limit, use_core_parallel)."""
    budget, limit = 24 << 20, 32 << 20          # conservative default
    try:
        cap = pltpu.get_tpu_info().vmem_capacity_bytes
    except Exception:
        cap = None
    if cap is not None:
        if cap >= (100 << 20):                  # v5e / v6e: 128 MiB physical
            budget, limit = 48 << 20, 64 << 20
        else:                                   # v7x-class: 64 MiB physical
            budget, limit = 20 << 20, 28 << 20
    core_parallel = False
    try:
        kind = jax.devices()[0].device_kind.lower()
        core_parallel = "v7" in kind            # 2 TensorCores per chip
    except Exception:
        pass
    return budget, limit, core_parallel


def _round_down8(x):
    return max(8, (int(x) // 8) * 8)


def _choose_tile_rows(B, N, itemsize, budget_bytes):
    """Row tile that (a) fits VMEM and (b) keeps enough grid steps to pipeline."""
    if B <= 64:
        return B
    # Double-buffered input tile + ~5 live [T, N] f32 temporaries in the body
    # (x_f32, ind, e, masked-e, plus spill/packing headroom).
    per_row = N * (2 * itemsize + 5 * 4) + 256
    vmem_tile = budget_bytes // per_row
    # Keep at least ~8 row tiles so the DMA/compute pipeline stays full.
    overlap_tile = -(-B // 8)
    tile = min(512, vmem_tile, overlap_tile)
    return int(min(_round_down8(tile), B))


def supcon_loss(logits, labels, neg_labels,
                temperature=0.07, contrast_mode='all', base_temperature=0.07,
                num_classes=None, tile_rows=None):
    """Pallas implementation of SupConLoss.forward.

    temperature / contrast_mode / base_temperature are stored by the PyTorch
    module but unused in this forward path; kept for signature parity.

    If `num_classes` is given (labels must be non-negative and < num_classes),
    the per-row positive count is precomputed with an O(B) bincount gather and
    streamed into the kernel, removing one full-row reduction.
    """
    del temperature, contrast_mode, base_temperature
    B, N = logits.shape
    if N != B + 1:
        raise ValueError("logits last dim must be batch_size + 1")
    if labels.shape[0] != B or neg_labels.shape[0] != B:
        raise ValueError("Num of labels does not match num of features")

    labels2 = labels.reshape(B, 1).astype(jnp.int32)                      # [B, 1]
    negrow = jnp.concatenate(
        [jnp.full((1, 1), _SENTINEL, jnp.int32),
         neg_labels.reshape(1, B).astype(jnp.int32)], axis=1)             # [1, N]

    budget, vmem_limit, core_parallel = _detect_platform()

    if tile_rows is None:
        tile = _choose_tile_rows(B, N, jnp.dtype(logits.dtype).itemsize, budget)
    else:
        tile = int(tile_rows)
        if tile >= B:
            tile = B
        elif tile % 8 != 0:
            raise ValueError("tile_rows must be a multiple of 8 (or >= B)")

    grid = (pl.cdiv(B, tile),)

    in_specs = [
        pl.BlockSpec((tile, N), lambda i: (i, 0)),   # logits row tile
        pl.BlockSpec((tile, 1), lambda i: (i, 0)),   # labels row tile
        pl.BlockSpec((1, N), lambda i: (0, 0)),      # sentinel + neg labels row
    ]
    inputs = [logits, labels2, negrow]

    if num_classes is not None:
        counts = jnp.bincount(neg_labels.reshape(-1).astype(jnp.int32),
                              length=int(num_classes))
        den = (1.0 + counts[labels.reshape(-1).astype(jnp.int32)]
               ).astype(jnp.float32).reshape(B, 1)
        in_specs.append(pl.BlockSpec((tile, 1), lambda i: (i, 0)))
        inputs.append(den)
        kernel = _supcon_kernel_den
    else:
        kernel = _supcon_kernel

    def build(dim_sem):
        return pl.pallas_call(
            kernel,
            out_shape=jax.ShapeDtypeStruct((B, 1), jnp.float32),
            grid_spec=pltpu.PrefetchScalarGridSpec(
                num_scalar_prefetch=0,
                grid=grid,
                in_specs=in_specs,
                out_specs=pl.BlockSpec((tile, 1), lambda i: (i, 0)),
            ),
            compiler_params=pltpu.CompilerParams(
                dimension_semantics=dim_sem,
                vmem_limit_bytes=vmem_limit,
            ),
        )

    if core_parallel:
        try:
            loss_rows = build((pltpu.CORE_PARALLEL,))(*inputs)
        except Exception:
            # Fall back if this chip / grid rejects core-parallel lowering.
            loss_rows = build(("parallel",))(*inputs)
    else:
        loss_rows = build(("parallel",))(*inputs)

    # Tiny final reduction in plain JAX (B f32 values).
    return jnp.mean(loss_rows)


def _supcon_loss_ref(logits, labels, neg_labels):
    """Pure-JAX reference mirroring the PyTorch forward."""
    B = logits.shape[0]
    labels = labels.reshape(B, 1)
    neg_labels = neg_labels.reshape(B, 1)
    mask = (labels == neg_labels.T).astype(jnp.float32)
    mask = jnp.concatenate([jnp.ones((B, 1), jnp.float32), mask], axis=1)
    p = jax.nn.softmax(logits.astype(jnp.float32), axis=-1)
    v = (p * mask).sum(axis=-1) / mask.sum(axis=-1)
    return jnp.mean(-jnp.log(v))


if __name__ == "__main__":
    # Case 1: small single-tile case (B=8 -> logits [8, 9]).
    B = 8
    k1, k2, k3 = jax.random.split(jax.random.PRNGKey(0), 3)
    logits = jax.random.normal(k1, (B, B + 1), dtype=jnp.float32)
    labels = jax.random.randint(k2, (B,), 0, 3, dtype=jnp.int32)
    neg_labels = jax.random.randint(k3, (B,), 0, 3, dtype=jnp.int32)
    out = jax.block_until_ready(supcon_loss(logits, labels, neg_labels))
    ref = _supcon_loss_ref(logits, labels, neg_labels)
    assert jnp.allclose(out, ref, rtol=1e-5, atol=1e-5), (out, ref)

    # Case 2: multi-tile grid with a partial last tile (B=24, tile_rows=16).
    B = 24
    k1, k2, k3 = jax.random.split(jax.random.PRNGKey(1), 3)
    logits = jax.random.normal(k1, (B, B + 1), dtype=jnp.float32)
    labels = jax.random.randint(k2, (B,), 0, 4, dtype=jnp.int32)
    neg_labels = jax.random.randint(k3, (B,), 0, 4, dtype=jnp.int32)
    out = jax.block_until_ready(supcon_loss(logits, labels, neg_labels, tile_rows=16))
    ref = _supcon_loss_ref(logits, labels, neg_labels)
    assert jnp.allclose(out, ref, rtol=1e-5, atol=1e-5), (out, ref)

    # Case 3: bf16 logits streamed straight from HBM (f32 compute in-kernel).
    logits_bf16 = logits.astype(jnp.bfloat16)
    out_bf16 = jax.block_until_ready(
        supcon_loss(logits_bf16, labels, neg_labels, tile_rows=16))
    ref_bf16 = _supcon_loss_ref(logits_bf16.astype(jnp.float32), labels, neg_labels)
    assert jnp.allclose(out_bf16, ref_bf16, rtol=2e-2, atol=2e-2), (out_bf16, ref_bf16)

    # Case 4: precomputed-denominator path (known label cardinality).
    out_den = jax.block_until_ready(
        supcon_loss(logits, labels, neg_labels, num_classes=4, tile_rows=16))
    assert jnp.allclose(out_den, ref, rtol=1e-5, atol=1e-5), (out_den, ref)

    print("KERNEL_OK")
</pallas_src>

<mosaic_0001>
module attributes {stable_mosaic.version = 11 : i64} {
  func.func @_supcon_kernel(%arg0: i32, %arg1: memref<8x9xf32, #tpu.memory_space<vmem>>, %arg2: memref<8x1xi32, #tpu.memory_space<vmem>>, %arg3: memref<1x9xi32, #tpu.memory_space<vmem>>, %arg4: memref<8x1xf32, #tpu.memory_space<vmem>>) attributes {dimension_semantics = [#tpu.dimension_semantics<parallel>], iteration_bounds = array<i64: 1>, scalar_prefetch = 0 : i64, scratch_operands = 0 : i64, tpu.core_type = #tpu.core_type<tc>, window_params = [{transform_indices = @transform_0, window_bounds = array<i64: 8, 9>}, {transform_indices = @transform_1, window_bounds = array<i64: 8, 1>}, {pipeline_mode = #tpu.pipeline_mode<synchronous>, transform_indices = @transform_2, window_bounds = array<i64: 1, 9>}, {transform_indices = @transform_3, window_bounds = array<i64: 8, 1>}]} {
    %c0 = arith.constant 0 : index
    %c0_0 = arith.constant 0 : index
    %0 = vector.load %arg1[%c0, %c0_0] : memref<8x9xf32, #tpu.memory_space<vmem>>, vector<8x9xf32>
    %c0_1 = arith.constant 0 : index
    %c0_2 = arith.constant 0 : index
    %1 = vector.load %arg2[%c0_1, %c0_2] : memref<8x1xi32, #tpu.memory_space<vmem>>, vector<8x1xi32>
    %c0_3 = arith.constant 0 : index
    %c0_4 = arith.constant 0 : index
    %2 = vector.load %arg3[%c0_3, %c0_4] : memref<1x9xi32, #tpu.memory_space<vmem>>, vector<1x9xi32>
    %3 = vector.broadcast %1 : vector<8x1xi32> to vector<8x9xi32>
    %4 = vector.broadcast %2 : vector<1x9xi32> to vector<8x9xi32>
    %5 = arith.cmpi eq, %3, %4 : vector<8x9xi32>
    %cst = arith.constant dense<0xFF800000> : vector<8xf32>
    %6 = vector.multi_reduction <maximumf>, %0, %cst [1] : vector<8x9xf32> to vector<8xf32>
    %7 = vector.shape_cast %6 : vector<8xf32> to vector<8x1xf32>
    %8 = vector.broadcast %7 : vector<8x1xf32> to vector<8x9xf32>
    %9 = arith.subf %0, %8 : vector<8x9xf32>
    %10 = math.exp %9 : vector<8x9xf32>
    %cst_5 = arith.constant dense<0.000000e+00> : vector<8xf32>
    %11 = vector.multi_reduction <add>, %10, %cst_5 [1] : vector<8x9xf32> to vector<8xf32>
    %12 = vector.shape_cast %11 : vector<8xf32> to vector<8x1xf32>
    %cst_6 = arith.constant 0.000000e+00 : f32
    %13 = vector.broadcast %cst_6 : f32 to vector<8x9xf32>
    %14 = arith.select %5, %10, %13 : vector<8x9xi1>, vector<8x9xf32>
    %cst_7 = arith.constant dense<0.000000e+00> : vector<8xf32>
    %15 = vector.multi_reduction <add>, %14, %cst_7 [1] : vector<8x9xf32> to vector<8xf32>
    %16 = vector.shape_cast %15 : vector<8xf32> to vector<8x1xf32>
    %17 = vector.extract_strided_slice %10 {offsets = [0, 0], sizes = [8, 1], strides = [1, 1]} : vector<8x9xf32> to vector<8x1xf32>
    %18 = arith.addf %16, %17 : vector<8x1xf32>
    %19 = arith.extui %5 : vector<8x9xi1> to vector<8x9xi32>
    %20 = arith.sitofp %19 : vector<8x9xi32> to vector<8x9xf32>
    %cst_8 = arith.constant dense<0.000000e+00> : vector<8xf32>
    %21 = vector.multi_reduction <add>, %20, %cst_8 [1] : vector<8x9xf32> to vector<8xf32>
    %22 = vector.shape_cast %21 : vector<8xf32> to vector<8x1xf32>
    %cst_9 = arith.constant 1.000000e+00 : f32
    %23 = vector.broadcast %cst_9 : f32 to vector<8x1xf32>
    %24 = arith.addf %22, %23 : vector<8x1xf32>
    %25 = math.log %12 : vector<8x1xf32>
    %26 = math.log %18 : vector<8x1xf32>
    %27 = arith.subf %25, %26 : vector<8x1xf32>
    %28 = math.log %24 : vector<8x1xf32>
    %29 = arith.addf %27, %28 : vector<8x1xf32>
    %c0_10 = arith.constant 0 : index
    %c0_11 = arith.constant 0 : index
    %30 = vector.load %arg4[%c0_10, %c0_11] : memref<8x1xf32, #tpu.memory_space<vmem>>, vector<8x1xf32>
    tpu.vector_store %arg4[%c0_10, %c0_11], %29 {strides = array<i32>} : memref<8x1xf32, #tpu.memory_space<vmem>>, vector<8x1xf32>,
    return
  }
  func.func @transform_0(%arg0: i32) -> (i32, i32) {
    %c0_i32 = arith.constant 0 : i32
    %c0_i32_0 = arith.constant 0 : i32
    return %arg0, %c0_i32 : i32, i32
  }
  func.func @transform_1(%arg0: i32) -> (i32, i32) {
    %c0_i32 = arith.constant 0 : i32
    %c0_i32_0 = arith.constant 0 : i32
    return %arg0, %c0_i32 : i32, i32
  }
  func.func @transform_2(%arg0: i32) -> (i32, i32) {
    %c0_i32 = arith.constant 0 : i32
    %c0_i32_0 = arith.constant 0 : i32
    %c0_i32_1 = arith.constant 0 : i32
    return %c0_i32, %c0_i32_0 : i32, i32
  }
  func.func @transform_3(%arg0: i32) -> (i32, i32) {
    %c0_i32 = arith.constant 0 : i32
    %c0_i32_0 = arith.constant 0 : i32
    return %arg0, %c0_i32 : i32, i32
  }
}

</mosaic_0001>

<bundles_post_ra>
// kernel: tpu_custom_call.1
= control target key start
LH: loop header
LB: loop body
LE: loop exit
PB: predicated region body
PF: predicated region fallthrough
CT: control target
= control target key end

     0   :  { %vm22_vm0 = vcmask 72704   ;;  %v70_v1 = vmov 0   ;;  %v71_v10 = vmov 0.0   ;;  %vm51_vm2 = vcmask 7168   ;;  %s108_s0 = inlined_call_operand.vmem [shape: f32[8,9], index: 0, kind: input, shape index: {}]   ;;  %s109_s2 = inlined_call_operand.vmem [shape: s32[1,9], index: 2, kind: input, shape index: {}]   ;;  %s110_s1 = inlined_call_operand.vmem [shape: s32[8,1], index: 1, kind: input, shape index: {}]   ;;  %s111_s3 = inlined_call_operand.vmem [shape: f32[8,1], index: 3, kind: output, shape index: {}]  }
   0x1   :  { %v14_v0 = vld [vmem:[%s108_s0] sm:$0xff]  ;;  %60 = vset.pattern.permute.xlu0 %v70_v1 }
   0x2   :  { %v23_v2 = vsel %vm22_vm0, %v14_v0, -inf  ;;  %v15_v3 = vld [vmem:[%s110_s1] sm:$0xff] }
   0x3   :  { %24 = vmax.xlane.f32.xlu0 %v23_v2  ;;  %v61_v7 = vld [vmem:[%s109_s2] ss:$0 sm:$0xff] }
  0x17   :  { %18 = vperm.xlu0 %60, %v15_v3  }
  0x76   :  { %v25_v4 = vpop.xlane.xlu0 %24 }
  0x77   :  { %v26_v5 = vsub.f32 %v14_v0, %v25_v4 }
  0x79   :  { %v27_v6 = vmul.f32 1.442695, %v26_v5 }
  0x7b   :  { %62 = vpow2.f32 %v27_v6 }
  0x81   :  { %v63_v9 = vpop.eup %62 }
  0x82   :  { %v29_v15 = vsel %vm22_vm0, %v63_v9, 0.0 }
  0x89   :  { %v19_v8 = vpop.permute.xlu0 %18 }
  0x8a   :  { %vm21_vm1 = vcmp.eq.s32.totalorder %v19_v8, %v61_v7 }
  0x8b   :  { %v57_v11 = vsel %vm21_vm1, 1.0, %v71_v10  ;;  %v32_v12 = vsel %vm21_vm1, %v63_v9, 0.0 }
  0x8c   :  { %v39_v13 = vsel %vm22_vm0, %v57_v11, 0.0  ;;  %v33_v14 = vsel %vm22_vm0, %v32_v12, 0.0 }
  0x8d   :  { %40 = vadd.xlane.f32.xlu2 %v39_v13  ;;  %34 = vadd.xlane.f32.xlu1 %v33_v14 }
  0x95   :  { %30 = vadd.xlane.f32.xlu1 %v29_v15 }
 0x100   :  { %v35_v16 = vpop.xlane.xlu1 %34  ;;  %v41_v17 = vpop.xlane.xlu2 %40 }
 0x101   :  { %v36_v18 = vadd.f32 %v63_v9, %v35_v16  ;;  %v42_v19 = vadd.f32 1.0, %v41_v17 }
 0x103   :  { %64 = vlog2.f32 %v36_v18 }
 0x104   :  { %66 = vlog2.f32 %v42_v19 }
 0x108   :  { %v31_v20 = vpop.xlane.xlu1 %30 }
 0x109   :  { %68 = vlog2.f32 %v31_v20  ;;  %v65_v21 = vpop.eup %64 }
 0x10a   :  { %v67_v22 = vpop.eup %66  ;;  %v46_v24 = vmul.f32 0.6931472, %v65_v21 }
 0x10b   :  { %v49_v26 = vmul.f32 0.6931472, %v67_v22 }
 0x10f   :  { %v69_v23 = vpop.eup %68 }
 0x110   :  { %v44_v25 = vmul.f32 0.6931472, %v69_v23 }
 0x112   :  { %v47_v27 = vsub.f32 %v44_v25, %v46_v24 }
 0x114   :  { %v50_v28 = vadd.f32 %v49_v26, %v47_v27 }
 0x116   :  { %52 = vst.msk [vmem:[%s111_s3] sm:$0xff] %vm51_vm2, %v50_v28 }

</bundles_post_ra>
